<compile_context>
chip_gen: v7x
topology: tpu7x:2x2x1
jax: 0.10.0
libtpu: 0.0.40
codegen_flags: <defaults>
</compile_context>

<pallas_src>
import functools

import jax
import jax.numpy as jnp
from jax.experimental import pallas as pl
from jax.experimental.pallas import tpu as pltpu

BN_EPS = 1e-5
COMPUTE_DTYPE = jnp.bfloat16   # MXU-native on all of v5e / v6e / v7x


# ---------------------------------------------------------------------------
# Kernel: whole decoder in one body.  refs = (x, w_0..w_L, b_packed, out).
# All weights stay VMEM-resident; activations are in-kernel SSA values.
# ---------------------------------------------------------------------------
def _decoder_kernel(dims, x_ref, *refs):
    o_ref = refs[-1]
    b_ref = refs[-2]          # [1, sum(dims)] packed biases (f32)
    w_refs = refs[:-2]        # bf16 [in, out] weights, BN pre-folded

    x = x_ref[...].astype(COMPUTE_DTYPE)
    off = 0
    last = len(w_refs) - 1
    for li, w_ref in enumerate(w_refs):
        d = dims[li]
        bias = b_ref[:, off:off + d]                      # static slice, f32
        off += d
        y = jnp.dot(x, w_ref[...],
                    preferred_element_type=jnp.float32) + bias
        if li < last:
            # ReLU; Dropout(0.2) is identity in eval mode.
            x = jnp.maximum(y, 0.0).astype(COMPUTE_DTYPE)
        else:
            o_ref[...] = y.astype(o_ref.dtype)            # lane-dense store


# ---------------------------------------------------------------------------
# One-time parameter preparation (hoisted out of the per-call path):
# fold eval-mode BatchNorm1d into each Linear, cast weights to bf16, pack all
# biases into a single lane-dense [1, sum(dims)] array.
# ---------------------------------------------------------------------------
def prepare_decoder_params(params):
    ws, bs = [], []
    for layer in params["hidden"]:
        scale = layer["gamma"] * jax.lax.rsqrt(layer["var"] + BN_EPS)  # [1, h]
        ws.append(layer["w"] * scale)
        bs.append((layer["b"] - layer["mean"]) * scale + layer["beta"])
    ws.append(params["out_w"])
    bs.append(params["out_b"])
    return {
        "ws": [w.astype(COMPUTE_DTYPE) for w in ws],
        "b_packed": jnp.concatenate(bs, axis=1).astype(jnp.float32),
    }


def _vmem_limit_bytes(total_operand_bytes):
    """Only raise the scoped-VMEM limit when needed; clamp to device capacity."""
    need = total_operand_bytes + (4 << 20)
    if need <= (16 << 20):
        return None                       # default scoped limit suffices everywhere
    try:
        cap = int(pltpu.get_tpu_info().vmem_capacity_bytes)
    except Exception:                     # pragma: no cover - conservative fallback
        cap = 64 << 20                    # v7x physical VMEM (most restrictive gen)
    return min(need, cap - (8 << 20))
    # TODO(synk): if folded weights ever exceed ~half of device VMEM
    # (~28-32 MiB on v7x, ~56-64 MiB on v5e/v6e), switch from full weight
    # residency to a per-layer weight pipeline (pltpu.emit_pipeline).


# ---------------------------------------------------------------------------
# Forward wrapper: single pallas_call.  grid=() for small batches; a
# "parallel" 1-D batch grid (weights resident via constant index_map) for
# large batches.
# ---------------------------------------------------------------------------
@jax.jit
def decoder_forward(z, condition, folded):
    ws = folded["ws"]
    b_packed = folded["b_packed"]
    bsz = z.shape[0]
    d_out = ws[-1].shape[1]
    dims = tuple(int(w.shape[1]) for w in ws)

    # Fused concat: tiny [B, latent+cond] array built in the wrapper so the
    # kernel does a single K=(latent+cond) first-layer dot.
    x = jnp.concatenate([z, condition], axis=1)
    d_in = x.shape[1]

    operands = [x, *ws, b_packed]
    total_bytes = sum(int(op.size) * op.dtype.itemsize for op in operands)
    total_bytes += bsz * d_out * 4
    vmem_limit = _vmem_limit_bytes(total_bytes)

    kernel = functools.partial(_decoder_kernel, dims)
    out_shape = jax.ShapeDtypeStruct((bsz, d_out), jnp.float32)

    use_grid = bsz >= 256 and bsz % 128 == 0
    if not use_grid:
        # Small batch: one grid point, everything VMEM-resident, no pipeline.
        vmem_spec = pl.BlockSpec(memory_space=pltpu.MemorySpace.VMEM)
        cp = (pltpu.CompilerParams(vmem_limit_bytes=vmem_limit)
              if vmem_limit is not None else None)
        return pl.pallas_call(
            kernel,
            out_shape=out_shape,
            in_specs=[vmem_spec] * len(operands),
            out_specs=vmem_spec,
            compiler_params=cp,
        )(*operands)

    # Large batch: tile batch rows; weights/bias pinned via constant index_map.
    block_m = 256 if bsz % 256 == 0 else 128
    grid = (bsz // block_m,)
    in_specs = [pl.BlockSpec((block_m, d_in), lambda i: (i, 0))]
    in_specs += [pl.BlockSpec(w.shape, lambda i: (0, 0)) for w in ws]
    in_specs += [pl.BlockSpec(b_packed.shape, lambda i: (0, 0))]
    out_specs = pl.BlockSpec((block_m, d_out), lambda i: (i, 0))
    cp_kwargs = {"dimension_semantics": ("parallel",)}  # v7x: shard over 2 TCs
    if vmem_limit is not None:
        cp_kwargs["vmem_limit_bytes"] = vmem_limit
    return pl.pallas_call(
        kernel,
        out_shape=out_shape,
        grid=grid,
        in_specs=in_specs,
        out_specs=out_specs,
        compiler_params=pltpu.CompilerParams(**cp_kwargs),
    )(*operands)


# ---------------------------------------------------------------------------
# Parameter construction (mirrors Decoder.__init__ shapes; random BN stats so
# the BN-fold path is actually exercised by the correctness check).
# ---------------------------------------------------------------------------
def init_decoder_params(key, latent_dim, condition_dim, output_dim, hidden_dims):
    params = {"hidden": []}
    prev = latent_dim + condition_dim
    for h in hidden_dims:
        key, kw, kb, kg, kbe, km, kv = jax.random.split(key, 7)
        bound = float(prev) ** -0.5
        params["hidden"].append(dict(
            w=jax.random.uniform(kw, (prev, h), jnp.float32, -bound, bound),
            b=jax.random.uniform(kb, (1, h), jnp.float32, -bound, bound),
            gamma=1.0 + 0.1 * jax.random.normal(kg, (1, h), jnp.float32),
            beta=0.1 * jax.random.normal(kbe, (1, h), jnp.float32),
            mean=0.1 * jax.random.normal(km, (1, h), jnp.float32),
            var=jax.random.uniform(kv, (1, h), jnp.float32, 0.5, 1.5),
        ))
        prev = h
    key, kw, kb = jax.random.split(key, 3)
    bound = float(prev) ** -0.5
    params["out_w"] = jax.random.uniform(kw, (prev, output_dim), jnp.float32,
                                         -bound, bound)
    params["out_b"] = jax.random.uniform(kb, (1, output_dim), jnp.float32,
                                         -bound, bound)
    return params


def decoder_forward_ref(z, condition, params):
    """Pure-JAX f32 reference (un-fused, explicit eval-mode BatchNorm)."""
    hi = jax.lax.Precision.HIGHEST
    x = jnp.concatenate([z, condition], axis=1)
    for layer in params["hidden"]:
        y = jnp.dot(x, layer["w"], precision=hi) + layer["b"]
        y = (y - layer["mean"]) * jax.lax.rsqrt(layer["var"] + BN_EPS)
        y = y * layer["gamma"] + layer["beta"]
        x = jnp.maximum(y, 0.0)
    return jnp.dot(x, params["out_w"], precision=hi) + params["out_b"]


# ---------------------------------------------------------------------------
if __name__ == "__main__":
    BATCH = 8
    LATENT_DIM = 16
    CONDITION_DIM = 16
    OUTPUT_DIM = 128
    HIDDEN_DIMS = [128, 256, 256, 128]

    key = jax.random.PRNGKey(0)
    kz, kc, kp = jax.random.split(key, 3)
    z = jax.random.normal(kz, (BATCH, LATENT_DIM), jnp.float32)
    cond_idx = jax.random.randint(kc, (BATCH,), 0, CONDITION_DIM)
    condition = jax.nn.one_hot(cond_idx, CONDITION_DIM, dtype=jnp.float32)

    params = init_decoder_params(kp, LATENT_DIM, CONDITION_DIM,
                                 OUTPUT_DIM, HIDDEN_DIMS)
    folded = prepare_decoder_params(params)   # hoisted one-time BN fold / bf16 cast

    # Small-batch path (grid=(), everything VMEM-resident).
    out = decoder_forward(z, condition, folded)
    jax.block_until_ready(out)
    ref = decoder_forward_ref(z, condition, params)
    assert out.shape == (BATCH, OUTPUT_DIM)
    err = float(jnp.max(jnp.abs(out - ref)))
    scale = float(jnp.max(jnp.abs(ref))) + 1e-6
    assert err <= 5e-2 * scale, f"small-batch mismatch: err={err}, scale={scale}"

    # Large-batch path (1-D parallel batch grid, weights resident).
    BIG = 512
    kz2, kc2 = jax.random.split(jax.random.PRNGKey(1))
    z2 = jax.random.normal(kz2, (BIG, LATENT_DIM), jnp.float32)
    cond2 = jax.nn.one_hot(jax.random.randint(kc2, (BIG,), 0, CONDITION_DIM),
                           CONDITION_DIM, dtype=jnp.float32)
    out2 = decoder_forward(z2, cond2, folded)
    jax.block_until_ready(out2)
    ref2 = decoder_forward_ref(z2, cond2, params)
    err2 = float(jnp.max(jnp.abs(out2 - ref2)))
    scale2 = float(jnp.max(jnp.abs(ref2))) + 1e-6
    assert out2.shape == (BIG, OUTPUT_DIM)
    assert err2 <= 5e-2 * scale2, f"big-batch mismatch: err={err2}, scale={scale2}"

    print("KERNEL_OK")
</pallas_src>

<mosaic_0001>
module attributes {stable_mosaic.version = 11 : i64} {
  func.func @_decoder_kernel(%arg0: memref<8x32xf32, #tpu.memory_space<vmem>>, %arg1: memref<32x128xbf16, #tpu.memory_space<vmem>>, %arg2: memref<128x256xbf16, #tpu.memory_space<vmem>>, %arg3: memref<256x256xbf16, #tpu.memory_space<vmem>>, %arg4: memref<256x128xbf16, #tpu.memory_space<vmem>>, %arg5: memref<128x128xbf16, #tpu.memory_space<vmem>>, %arg6: memref<1x896xf32, #tpu.memory_space<vmem>>, %arg7: memref<8x128xf32, #tpu.memory_space<vmem>>) attributes {dimension_semantics = [], scalar_prefetch = 0 : i64, scratch_operands = 0 : i64, tpu.core_type = #tpu.core_type<tc>} {
    %c0 = arith.constant 0 : index
    %c0_0 = arith.constant 0 : index
    %0 = vector.load %arg0[%c0, %c0_0] : memref<8x32xf32, #tpu.memory_space<vmem>>, vector<8x32xf32>
    %1 = arith.truncf %0 : vector<8x32xf32> to vector<8x32xbf16>
    %c0_1 = arith.constant 0 : index
    %c0_2 = arith.constant 0 : index
    %2 = vector.load %arg6[%c0_1, %c0_2] : memref<1x896xf32, #tpu.memory_space<vmem>>, vector<1x128xf32>
    %c0_3 = arith.constant 0 : index
    %c0_4 = arith.constant 0 : index
    %3 = vector.load %arg1[%c0_3, %c0_4] : memref<32x128xbf16, #tpu.memory_space<vmem>>, vector<32x128xbf16>
    %cst = arith.constant dense<0.000000e+00> : vector<8x128xf32>
    %4 = tpu.matmul %1, %3, %cst {dimension_numbers = #tpu.dot_dimension_numbers<[1], [0], [0], [1], [0, 0, 1, 1], [], []>} : vector<8x32xbf16>, vector<32x128xbf16>, vector<8x128xf32> -> vector<8x128xf32>
    %5 = vector.broadcast %2 : vector<1x128xf32> to vector<8x128xf32>
    %6 = arith.addf %4, %5 : vector<8x128xf32>
    %cst_5 = arith.constant 0.000000e+00 : f32
    %7 = vector.broadcast %cst_5 : f32 to vector<8x128xf32>
    %8 = arith.maximumf %6, %7 : vector<8x128xf32>
    %9 = arith.truncf %8 : vector<8x128xf32> to vector<8x128xbf16>
    %c0_6 = arith.constant 0 : index
    %c128 = arith.constant 128 : index
    %10 = vector.load %arg6[%c0_6, %c128] : memref<1x896xf32, #tpu.memory_space<vmem>>, vector<1x256xf32>
    %c0_7 = arith.constant 0 : index
    %c0_8 = arith.constant 0 : index
    %11 = vector.load %arg2[%c0_7, %c0_8] : memref<128x256xbf16, #tpu.memory_space<vmem>>, vector<128x256xbf16>
    %cst_9 = arith.constant dense<0.000000e+00> : vector<8x256xf32>
    %12 = tpu.matmul %9, %11, %cst_9 {dimension_numbers = #tpu.dot_dimension_numbers<[1], [0], [0], [1], [0, 0, 1, 1], [], []>} : vector<8x128xbf16>, vector<128x256xbf16>, vector<8x256xf32> -> vector<8x256xf32>
    %13 = vector.broadcast %10 : vector<1x256xf32> to vector<8x256xf32>
    %14 = arith.addf %12, %13 : vector<8x256xf32>
    %cst_10 = arith.constant 0.000000e+00 : f32
    %15 = vector.broadcast %cst_10 : f32 to vector<8x256xf32>
    %16 = arith.maximumf %14, %15 : vector<8x256xf32>
    %17 = arith.truncf %16 : vector<8x256xf32> to vector<8x256xbf16>
    %c0_11 = arith.constant 0 : index
    %c384 = arith.constant 384 : index
    %18 = vector.load %arg6[%c0_11, %c384] : memref<1x896xf32, #tpu.memory_space<vmem>>, vector<1x256xf32>
    %c0_12 = arith.constant 0 : index
    %c0_13 = arith.constant 0 : index
    %19 = vector.load %arg3[%c0_12, %c0_13] : memref<256x256xbf16, #tpu.memory_space<vmem>>, vector<256x256xbf16>
    %cst_14 = arith.constant dense<0.000000e+00> : vector<8x256xf32>
    %20 = tpu.matmul %17, %19, %cst_14 {dimension_numbers = #tpu.dot_dimension_numbers<[1], [0], [0], [1], [0, 0, 1, 1], [], []>} : vector<8x256xbf16>, vector<256x256xbf16>, vector<8x256xf32> -> vector<8x256xf32>
    %21 = vector.broadcast %18 : vector<1x256xf32> to vector<8x256xf32>
    %22 = arith.addf %20, %21 : vector<8x256xf32>
    %cst_15 = arith.constant 0.000000e+00 : f32
    %23 = vector.broadcast %cst_15 : f32 to vector<8x256xf32>
    %24 = arith.maximumf %22, %23 : vector<8x256xf32>
    %25 = arith.truncf %24 : vector<8x256xf32> to vector<8x256xbf16>
    %c0_16 = arith.constant 0 : index
    %c640 = arith.constant 640 : index
    %26 = vector.load %arg6[%c0_16, %c640] : memref<1x896xf32, #tpu.memory_space<vmem>>, vector<1x128xf32>
    %c0_17 = arith.constant 0 : index
    %c0_18 = arith.constant 0 : index
    %27 = vector.load %arg4[%c0_17, %c0_18] : memref<256x128xbf16, #tpu.memory_space<vmem>>, vector<256x128xbf16>
    %cst_19 = arith.constant dense<0.000000e+00> : vector<8x128xf32>
    %28 = tpu.matmul %25, %27, %cst_19 {dimension_numbers = #tpu.dot_dimension_numbers<[1], [0], [0], [1], [0, 0, 1, 1], [], []>} : vector<8x256xbf16>, vector<256x128xbf16>, vector<8x128xf32> -> vector<8x128xf32>
    %29 = vector.broadcast %26 : vector<1x128xf32> to vector<8x128xf32>
    %30 = arith.addf %28, %29 : vector<8x128xf32>
    %cst_20 = arith.constant 0.000000e+00 : f32
    %31 = vector.broadcast %cst_20 : f32 to vector<8x128xf32>
    %32 = arith.maximumf %30, %31 : vector<8x128xf32>
    %33 = arith.truncf %32 : vector<8x128xf32> to vector<8x128xbf16>
    %c0_21 = arith.constant 0 : index
    %c768 = arith.constant 768 : index
    %34 = vector.load %arg6[%c0_21, %c768] : memref<1x896xf32, #tpu.memory_space<vmem>>, vector<1x128xf32>
    %c0_22 = arith.constant 0 : index
    %c0_23 = arith.constant 0 : index
    %35 = vector.load %arg5[%c0_22, %c0_23] : memref<128x128xbf16, #tpu.memory_space<vmem>>, vector<128x128xbf16>
    %cst_24 = arith.constant dense<0.000000e+00> : vector<8x128xf32>
    %36 = tpu.matmul %33, %35, %cst_24 {dimension_numbers = #tpu.dot_dimension_numbers<[1], [0], [0], [1], [0, 0, 1, 1], [], []>} : vector<8x128xbf16>, vector<128x128xbf16>, vector<8x128xf32> -> vector<8x128xf32>
    %37 = vector.broadcast %34 : vector<1x128xf32> to vector<8x128xf32>
    %38 = arith.addf %36, %37 : vector<8x128xf32>
    %c0_25 = arith.constant 0 : index
    %c0_26 = arith.constant 0 : index
    %39 = vector.load %arg7[%c0_25, %c0_26] : memref<8x128xf32, #tpu.memory_space<vmem>>, vector<8x128xf32>
    tpu.vector_store %arg7[%c0_25, %c0_26], %38 {strides = array<i32>} : memref<8x128xf32, #tpu.memory_space<vmem>>, vector<8x128xf32>,
    return
  }
}

</mosaic_0001>

<bundles_post_ra>
// kernel: decoder_forward.1
= control target key start
LH: loop header
LB: loop body
LE: loop exit
PB: predicated region body
PF: predicated region fallthrough
CT: control target
= control target key end

     0   :  { %12 = vsyncpa [#allocation3], 0  ;;  %s1387_s0 = inlined_call_operand.vmem [shape: f32[8,32], index: 0, kind: input, shape index: {}]   ;;  %s1388_s1 = inlined_call_operand.vmem [shape: bf16[32,128], index: 1, kind: input, shape index: {}]   ;;  %s1389_s2 = inlined_call_operand.hbm [shape: bf16[128,256], index: 2, kind: input, shape index: {}]   ;;  %s1390_s3 = inlined_call_operand.hbm [shape: bf16[256,256], index: 3, kind: input, shape index: {}]   ;;  %s1391_s4 = inlined_call_operand.hbm [shape: bf16[256,128], index: 4, kind: input, shape index: {}]   ;;  %s1392_s5 = inlined_call_operand.hbm [shape: bf16[128,128], index: 5, kind: input, shape index: {}]   ;;  %s1393_s6 = inlined_call_operand.vmem [shape: f32[1,896], index: 6, kind: input, shape index: {}]   ;;  %s1394_s7 = inlined_call_operand.hbm [shape: f32[8,128], index: 7, kind: output, shape index: {}]  }
   0x1   :  { %13 = vsyncpa [#allocation6], 0 }
   0x2   :  { %14 = vsyncpa [#allocation9], 0 }
   0x3   :  { %15 = vsyncpa [#allocation4], 0  ;;  %s1230_s24 = smov [#allocation5]   ;;  %s1231_s26 = smov [#allocation2]  }
   0x4   :  { %s37_s25 = sshll.u32 %s1230_s24, 4  ;;  %s25_s27 = sshll.u32 %s1231_s26, 4  ;;  %s38_s25 = int_to_ptr.vmem [resolvable:$true] %s37_s25  ;;  %s1282_s27 = int_to_ptr.vmem [resolvable:$true] %s25_s27 }
   0x5   :  { %s1112_s30 = scalar_lea.hbm %s1390_s3, 4096 }
   0x6   :  { %p1113_p0 = scmp.ne.s32.totalorder %s1390_s3, %s1112_s30  ;;  %p1116_p1 = scmp.lt.u32.totalorder %s1112_s30, %s1390_s3 }
   0x8   :  { %p1118_p2 = pnand %p1116_p1, %p1113_p0 }
   0xa   :  { %1121 = shalt.err (!%p1118_p2)
}
   0xb   :  { %s1122_s12 = scalar_lea.vmem %s38_s25, 4096  ;;  %p1127_p4 = scmp.lt.s32.totalorder %s38_s25, %s38_s25 }
   0xc   :  { %p1123_p3 = scmp.ne.s32.totalorder %s38_s25, %s1122_s12  ;;  %p1128_p5 = scmp.lt.s32.totalorder %s1122_s12, %s1122_s12 }
   0xe   :  { %p1129_p6 = por %p1128_p5, %p1127_p4 }
  0x10   :  { %p1130_p7 = pnand %p1129_p6, %p1123_p3 }
  0x12   :  { %1133 = shalt.err (!%p1130_p7)
}
  0x13   :  { %s1232_s13 = smov 128   ;;  %s1233_s14 = smov 8  }
  0x14   :  { %43 = dma.hbm_to_vmem [thread:$0]  %s1390_s3, 4096, %s38_s25, [#allocation6], %s1232_s13, %s1232_s13, %s1233_s14  }
  0x15   :  { %s1134_s19 = scalar_lea.hbm %s1389_s2, 2048 }
  0x16   :  { %p1135_p8 = scmp.ne.s32.totalorder %s1389_s2, %s1134_s19  ;;  %p1138_p9 = scmp.lt.u32.totalorder %s1134_s19, %s1389_s2 }
  0x18   :  { %p1140_p10 = pnand %p1138_p9, %p1135_p8 }
  0x1a   :  { %1143 = shalt.err (!%p1140_p10)
}
  0x1b   :  { %s1144_s24 = scalar_lea.vmem %s1282_s27, 2048  ;;  %p1149_p12 = scmp.lt.s32.totalorder %s1282_s27, %s1282_s27 }
  0x1c   :  { %p1145_p11 = scmp.ne.s32.totalorder %s1282_s27, %s1144_s24  ;;  %p1150_p13 = scmp.lt.s32.totalorder %s1144_s24, %s1144_s24 }
  0x1e   :  { %p1151_p0 = por %p1150_p13, %p1149_p12 }
  0x20   :  { %p1152_p1 = pnand %p1151_p0, %p1145_p11 }
  0x22   :  { %1155 = shalt.err (!%p1152_p1)
}
  0x23   :  { %31 = dma.hbm_to_vmem [thread:$0]  %s1389_s2, 2048, %s1282_s27, [#allocation3], %s1232_s13, %s1232_s13, %s1233_s14  }
  0x24   :  { %s1234_s26 = smov [#allocation7]   ;;  %s1156_s8 = scalar_lea.hbm %s1391_s4, 2048 }
  0x25   :  { %s49_s28 = sshll.u32 %s1234_s26, 4  ;;  %p1157_p2 = scmp.ne.s32.totalorder %s1391_s4, %s1156_s8  ;;  %s50_s28 = int_to_ptr.vmem [resolvable:$true] %s49_s28 }
  0x26   :  { %p1160_p3 = scmp.lt.u32.totalorder %s1156_s8, %s1391_s4 }
  0x28   :  { %p1162_p4 = pnand %p1160_p3, %p1157_p2 }
  0x2a   :  { %1165 = shalt.err (!%p1162_p4)
}
  0x2b   :  { %s1166_s15 = scalar_lea.vmem %s50_s28, 2048  ;;  %p1171_p6 = scmp.lt.s32.totalorder %s50_s28, %s50_s28 }
  0x2c   :  { %p1167_p5 = scmp.ne.s32.totalorder %s50_s28, %s1166_s15  ;;  %p1172_p7 = scmp.lt.s32.totalorder %s1166_s15, %s1166_s15 }
  0x2e   :  { %p1173_p8 = por %p1172_p7, %p1171_p6 }
  0x30   :  { %p1174_p9 = pnand %p1173_p8, %p1167_p5 }
  0x32   :  { %1177 = shalt.err (!%p1174_p9)
}
  0x33   :  { %s1235_s2 = smov 64   ;;  %s1236_s27 = smov 4  }
  0x34   :  { %55 = dma.hbm_to_vmem [thread:$0]  %s1391_s4, 2048, %s50_s28, [#allocation6], %s1235_s2, %s1235_s2, %s1236_s27  }
  0x35   :  { %s1237_s16 = smov [#allocation8]   ;;  %s1178_s20 = scalar_lea.hbm %s1392_s5, 1024 }
  0x36   :  { %s61_s17 = sshll.u32 %s1237_s16, 4  ;;  %p1179_p10 = scmp.ne.s32.totalorder %s1392_s5, %s1178_s20  ;;  %s62_s17 = int_to_ptr.vmem [resolvable:$true] %s61_s17 }
  0x37   :  { %p1182_p11 = scmp.lt.u32.totalorder %s1178_s20, %s1392_s5 }
  0x39   :  { %p1184_p12 = pnand %p1182_p11, %p1179_p10 }
  0x3b   :  { %1187 = shalt.err (!%p1184_p12)
}
  0x3c   :  { %s1188_s3 = scalar_lea.vmem %s62_s17, 1024  ;;  %p1193_p0 = scmp.lt.s32.totalorder %s62_s17, %s62_s17 }
  0x3d   :  { %p1189_p13 = scmp.ne.s32.totalorder %s62_s17, %s1188_s3  ;;  %p1194_p1 = scmp.lt.s32.totalorder %s1188_s3, %s1188_s3 }
  0x3f   :  { %p1195_p2 = por %p1194_p1, %p1193_p0 }
  0x41   :  { %p1196_p3 = pnand %p1195_p2, %p1189_p13 }
  0x43   :  { %1199 = shalt.err (!%p1196_p3)
}
  0x44   :  { %67 = dma.hbm_to_vmem [thread:$0]  %s1392_s5, 1024, %s62_s17, [#allocation9], %s1235_s2, %s1235_s2, %s1236_s27  }
  0x45   :  { %1222 = dma.done.wait [#allocation3], 2048  }
  0x46   :  { %1223 = vsyncadd [#allocation3], 4294965248 }
  0x47   :  { %1224 = dma.done.wait [#allocation6], 6144  }
  0x48   :  { %1225 = vsyncadd [#allocation6], 4294961152 }
  0x49   :  { %1226 = dma.done.wait [#allocation9], 1024  }
  0x4a   :  { %1227 = vsyncadd [#allocation9], 4294966272  ;;  %v1238_v0 = vmov 0.0   ;;  %vm1239_vm0 = vmmov 0   ;;  %v1014_v1 = vld [vmem:[%s1388_s1] sm:$0xff]   ;;  %v1015_v2 = vld [vmem:[%s1388_s1 + $0x8] sm:$0xff]  }
  0x4b   :  { %974 = vmatprep.subr.bf16.mxu0 %v1238_v0  ;;  %978 = vmatprep.mubr.msk.bf16.mxu0 %vm1239_vm0, %v1238_v0  ;;  %v83_v3 = vld [vmem:[%s1387_s0] sm:$0xff]  ;;  %v1016_v4 = vld [vmem:[#allocation2 + $0x4] ss:$8 sps:$4 sm:$0xff]   ;;  %v1018_v5 = vld [vmem:[#allocation2] ss:$8 sps:$4 sm:$0xff]   ;;  %vm108_vm1 = vcmask 261120  }
  0x4c   :  { %975 = vmatpush3.bf16.msra.mxu0 %v1014_v1  ;;  %v1019_v6 = vld [vmem:[#allocation2 + $0x14] ss:$8 sps:$4 sm:$0xff]   ;;  %v84_v7 = vpack.c.bf16 %v83_v3, %v83_v3  ;;  %262 = vmatprep.subr.bf16.mxu1 %v1016_v4  ;;  %v1021_v8 = vld [vmem:[#allocation2 + $0x10] ss:$8 sps:$4 sm:$0xff]   ;;  %v1022_v9 = vld [vmem:[#allocation2 + $0x24] ss:$8 sps:$4 sm:$0xff]  }
  0x4d   :  { %976 = vmatprep.subr.bf16.mxu0 %v1238_v0  ;;  %263 = vmatpush1.bf16.msra.mxu1 %v1018_v5  ;;  %v1024_v10 = vld [vmem:[#allocation2 + $0x20] ss:$8 sps:$4 sm:$0xff]   ;;  %v1025_v11 = vld [vmem:[#allocation2 + $0x34] ss:$8 sps:$4 sm:$0xff]   ;;  %v1027_v12 = vld [vmem:[#allocation2 + $0x30] ss:$8 sps:$4 sm:$0xff]  }
  0x4e   :  { %264 = vmatprep.subr.bf16.mxu1 %v1019_v6  ;;  %v1028_v13 = vld [vmem:[#allocation2 + $0x44] ss:$8 sps:$4 sm:$0xff]   ;;  %v1030_v14 = vld [vmem:[#allocation2 + $0x40] ss:$8 sps:$4 sm:$0xff]   ;;  %v1031_v15 = vld [vmem:[#allocation2 + $0x54] ss:$8 sps:$4 sm:$0xff]  }
  0x4f   :  { %v1033_v16 = vld [vmem:[#allocation2 + $0x50] ss:$8 sps:$4 sm:$0xff]   ;;  %v1034_v17 = vld [vmem:[#allocation2 + $0x64] ss:$8 sps:$4 sm:$0xff]   ;;  %v1036_v18 = vld [vmem:[#allocation2 + $0x60] ss:$8 sps:$4 sm:$0xff]  }
  0x50   :  { %977 = vmatpush3.bf16.msra.mxu0 %v1015_v2  ;;  %v1037_v19 = vld [vmem:[#allocation2 + $0x74] ss:$8 sps:$4 sm:$0xff]   ;;  %v1039_v20 = vld [vmem:[#allocation2 + $0x70] ss:$8 sps:$4 sm:$0xff]   ;;  %v1240_v21 = vmov 0   ;;  %v1088_v62 = vld [vmem:[#allocation7 + $0x40] sm:$0xff]  }
  0x51   :  { %265 = vmatpush1.bf16.msra.mxu1 %v1021_v8  ;;  %294 = vmatprep.mubr.bf16.mxu1 %v1240_v21  ;;  %v1040_v22 = vld [vmem:[#allocation5] ss:$8 sps:$4 sm:$0xff]   ;;  %v1042_v23 = vld [vmem:[#allocation5 + $0x4] ss:$8 sps:$4 sm:$0xff]   ;;  %v1045_v24 = vld [vmem:[#allocation5 + $0x14] ss:$8 sps:$4 sm:$0xff]  }
  0x52   :  { %266 = vmatprep.subr.bf16.mxu1 %v1022_v9  ;;  %511 = vmatprep.subr.bf16.mxu0 %v1042_v23  ;;  %v1043_v25 = vld [vmem:[#allocation5 + $0x10] ss:$8 sps:$4 sm:$0xff]   ;;  %v1048_v26 = vld [vmem:[#allocation5 + $0x24] ss:$8 sps:$4 sm:$0xff]   ;;  %v1046_v27 = vld [vmem:[#allocation5 + $0x20] ss:$8 sps:$4 sm:$0xff]  }
  0x53   :  { %979 = vmatmul.mubr.msk.bf16.vlgmr.msra.gmra.mrb[0].mxu0 %vm108_vm1, %v84_v7  ;;  %v1051_v28 = vld [vmem:[#allocation5 + $0x34] ss:$8 sps:$4 sm:$0xff]   ;;  %v1049_v29 = vld [vmem:[#allocation5 + $0x30] ss:$8 sps:$4 sm:$0xff]   ;;  %v1054_v30 = vld [vmem:[#allocation5 + $0x44] ss:$8 sps:$4 sm:$0xff]  }
  0x54   :  { %512 = vmatpush1.bf16.msra.mxu0 %v1040_v22  ;;  %v1052_v31 = vld [vmem:[#allocation5 + $0x40] ss:$8 sps:$4 sm:$0xff]   ;;  %v1057_v32 = vld [vmem:[#allocation5 + $0x54] ss:$8 sps:$4 sm:$0xff]   ;;  %v1055_v33 = vld [vmem:[#allocation5 + $0x50] ss:$8 sps:$4 sm:$0xff]  }
  0x55   :  { %267 = vmatpush1.bf16.msra.mxu1 %v1024_v10  ;;  %513 = vmatprep.subr.bf16.mxu0 %v1045_v24  ;;  %v1060_v34 = vld [vmem:[#allocation5 + $0x64] ss:$8 sps:$4 sm:$0xff]   ;;  %v1058_v35 = vld [vmem:[#allocation5 + $0x60] ss:$8 sps:$4 sm:$0xff]   ;;  %v1063_v36 = vld [vmem:[#allocation5 + $0x74] ss:$8 sps:$4 sm:$0xff]  }
  0x56   :  { %268 = vmatprep.subr.bf16.mxu1 %v1025_v11  ;;  %v1061_v37 = vld [vmem:[#allocation5 + $0x70] ss:$8 sps:$4 sm:$0xff]   ;;  %v1066_v38 = vld [vmem:[#allocation5 + $0x84] ss:$8 sps:$4 sm:$0xff]   ;;  %v1064_v39 = vld [vmem:[#allocation5 + $0x80] ss:$8 sps:$4 sm:$0xff]   ;;  %v172_v11 = vlaneseq }
  0x57   :  { %v1069_v40 = vld [vmem:[#allocation5 + $0x94] ss:$8 sps:$4 sm:$0xff]   ;;  %v1067_v41 = vld [vmem:[#allocation5 + $0x90] ss:$8 sps:$4 sm:$0xff]   ;;  %v1072_v42 = vld [vmem:[#allocation5 + $0xa4] ss:$8 sps:$4 sm:$0xff]  }
  0x58   :  { %514 = vmatpush1.bf16.msra.mxu0 %v1043_v25  ;;  %v1070_v43 = vld [vmem:[#allocation5 + $0xa0] ss:$8 sps:$4 sm:$0xff]   ;;  %v1075_v44 = vld [vmem:[#allocation5 + $0xb4] ss:$8 sps:$4 sm:$0xff]   ;;  %v1073_v45 = vld [vmem:[#allocation5 + $0xb0] ss:$8 sps:$4 sm:$0xff]  }
  0x59   :  { %269 = vmatpush1.bf16.msra.mxu1 %v1027_v12  ;;  %515 = vmatprep.subr.bf16.mxu0 %v1048_v26  ;;  %v1078_v46 = vld [vmem:[#allocation5 + $0xc4] ss:$8 sps:$4 sm:$0xff]   ;;  %v1076_v47 = vld [vmem:[#allocation5 + $0xc0] ss:$8 sps:$4 sm:$0xff]   ;;  %v1081_v48 = vld [vmem:[#allocation5 + $0xd4] ss:$8 sps:$4 sm:$0xff]  }
  0x5a   :  { %270 = vmatprep.subr.bf16.mxu1 %v1028_v13  ;;  %v1079_v49 = vld [vmem:[#allocation5 + $0xd0] ss:$8 sps:$4 sm:$0xff]   ;;  %v1084_v58 = vld [vmem:[#allocation5 + $0xe4] ss:$8 sps:$4 sm:$0xff]   ;;  %v1082_v59 = vld [vmem:[#allocation5 + $0xe0] ss:$8 sps:$4 sm:$0xff]  }
  0x5b   :  { %v862_v50 = vld [vmem:[%s1393_s6] ss:$0 sm:$0xff]  ;;  %v1087_v60 = vld [vmem:[#allocation5 + $0xf4] ss:$8 sps:$4 sm:$0xff]   ;;  %v1089_v63 = vld [vmem:[#allocation7] sm:$0xff]   ;;  %v173_v12 = vshrl.u32 %v172_v11, 7 }
  0x5c   :  { %516 = vmatpush1.bf16.msra.mxu0 %v1046_v27  ;;  %v1085_v61 = vld [vmem:[#allocation5 + $0xf0] ss:$8 sps:$4 sm:$0xff]   ;;  %v1090_v1 = vld [vmem:[#allocation7 + $0x48] sm:$0xff]   ;;  %v1096_v7 = vld [vmem:[#allocation7 + $0x60] sm:$0xff]   ;;  %s1241_s14 = smov [#allocation10]  }
  0x5d   :  { %271 = vmatpush1.bf16.msra.mxu1 %v1030_v14  ;;  %517 = vmatprep.subr.bf16.mxu0 %v1051_v28  ;;  %v1091_v2 = vld [vmem:[#allocation7 + $0x8] sm:$0xff]   ;;  %v1092_v3 = vld [vmem:[#allocation7 + $0x50] sm:$0xff]   ;;  %v1094_v5 = vld [vmem:[#allocation7 + $0x58] sm:$0xff]   ;;  %v174_v13 = vsub.s32 0, %v173_v12  ;;  %s851_s16 = sshll.u32 %s1241_s14, 4  ;;  %s852_s16 = int_to_ptr.vmem [resolvable:$true] %s851_s16 }
  0x5e   :  { %272 = vmatprep.subr.bf16.mxu1 %v1031_v15  ;;  %v1093_v4 = vld [vmem:[#allocation7 + $0x10] sm:$0xff]   ;;  %v1095_v6 = vld [vmem:[#allocation7 + $0x18] sm:$0xff]   ;;  %v1097_v8 = vld [vmem:[#allocation7 + $0x20] sm:$0xff]   ;;  %v178_v15 = vsub.s32 1, %v173_v12  ;;  %s1200_s17 = scalar_lea.vmem %s852_s16, 128  ;;  %p1205_p5 = scmp.lt.s32.totalorder %s852_s16, %s852_s16 }
  0x5f   :  { %v1098_v9 = vld [vmem:[#allocation7 + $0x68] sm:$0xff]   ;;  %v154_v14 = vld [vmem:[%s1393_s6 + $0x1] sm:$0x3]  ;;  %p1201_p4 = scmp.ne.s32.totalorder %s852_s16, %s1200_s17  ;;  %p1206_p6 = scmp.lt.s32.totalorder %s1200_s17, %s1200_s17 }
  0x60   :  { %518 = vmatpush1.bf16.msra.mxu0 %v1049_v29  ;;  %v1099_v10 = vld [vmem:[#allocation7 + $0x28] sm:$0xff]   ;;  %v1100_v28 = vld [vmem:[#allocation7 + $0x70] sm:$0xff]  }
  0x61   :  { %273 = vmatpush1.bf16.msra.mxu1 %v1033_v16  ;;  %519 = vmatprep.subr.bf16.mxu0 %v1054_v30  ;;  %v175_v16 = vrot.slane %v154_v14, %v174_v13  ;;  %v1101_v29 = vld [vmem:[#allocation7 + $0x30] sm:$0xff]   ;;  %v1102_v30 = vld [vmem:[#allocation7 + $0x78] sm:$0xff]   ;;  %p1207_p7 = por %p1206_p6, %p1205_p5 }
  0x62   :  { %274 = vmatprep.subr.bf16.mxu1 %v1034_v17  ;;  %v179_v17 = vrot.slane %v154_v14, %v178_v15 }
  0x63   :  { %p1208_p8 = pnand %p1207_p7, %p1201_p4 }
  0x64   :  { %520 = vmatpush1.bf16.msra.mxu0 %v1052_v31  ;;  %v1103_v31 = vld [vmem:[#allocation7 + $0x38] sm:$0xff]  }
  0x65   :  { %275 = vmatpush1.bf16.msra.mxu1 %v1036_v18  ;;  %521 = vmatprep.subr.bf16.mxu0 %v1057_v32  ;;  %v307_v32 = vld [vmem:[%s1393_s6 + $0x3] sm:$0x3] }
  0x66   :  { %276 = vmatprep.subr.bf16.mxu1 %v1037_v19 }
  0x68   :  { %522 = vmatpush1.bf16.msra.mxu0 %v1055_v33  ;;  %v344_v33 = vrot.slane %v307_v32, %v174_v13 }
  0x69   :  { %277 = vmatpush1.bf16.msra.mxu1 %v1039_v20  ;;  %523 = vmatprep.subr.bf16.mxu0 %v1060_v34  ;;  %v348_v34 = vrot.slane %v307_v32, %v178_v15 }
  0x6a   :  { %943 = vmatprep.subr.bf16.mxu1 %v1088_v62  ;;  %v931_v62 = vld [vmem:[%s1393_s6 + $0x6] ss:$0 sm:$0xff] }
  0x6c   :  { %524 = vmatpush1.bf16.msra.mxu0 %v1058_v35 }
  0x6d   :  { %525 = vmatprep.subr.bf16.mxu0 %v1063_v36 }
  0x70   :  { %526 = vmatpush1.bf16.msra.mxu0 %v1061_v37 }
  0x71   :  { %527 = vmatprep.subr.bf16.mxu0 %v1066_v38 }
  0x74   :  { %528 = vmatpush1.bf16.msra.mxu0 %v1064_v39 }
  0x75   :  { %529 = vmatprep.subr.bf16.mxu0 %v1069_v40 }
  0x78   :  { %530 = vmatpush1.bf16.msra.mxu0 %v1067_v41 }
  0x79   :  { %531 = vmatprep.subr.bf16.mxu0 %v1072_v42 }
  0x7c   :  { %532 = vmatpush1.bf16.msra.mxu0 %v1070_v43 }
  0x7d   :  { %533 = vmatprep.subr.bf16.mxu0 %v1075_v44  ;;  %v1104_v44 = vld [vmem:[#allocation8] sm:$0xff]  }
  0x80   :  { %534 = vmatpush1.bf16.msra.mxu0 %v1073_v45 }
  0x81   :  { %535 = vmatprep.subr.bf16.mxu0 %v1078_v46  ;;  %v1105_v46 = vld [vmem:[#allocation8 + $0x8] sm:$0xff]  }
  0x84   :  { %536 = vmatpush1.bf16.msra.mxu0 %v1076_v47  ;;  %v1106_v47 = vld [vmem:[#allocation8 + $0x10] sm:$0xff]  }
  0x85   :  { %537 = vmatprep.subr.bf16.mxu0 %v1081_v48  ;;  %v1107_v48 = vld [vmem:[#allocation8 + $0x18] sm:$0xff]  }
  0x88   :  { %538 = vmatpush1.bf16.msra.mxu0 %v1079_v49  ;;  %v1108_v49 = vld [vmem:[#allocation8 + $0x20] sm:$0xff]  }
  0x89   :  { %539 = vmatprep.subr.bf16.mxu0 %v1084_v58 }
  0x8c   :  { %540 = vmatpush1.bf16.msra.mxu0 %v1082_v59 }
  0x8d   :  { %541 = vmatprep.subr.bf16.mxu0 %v1087_v60 }
  0x90   :  { %542 = vmatpush1.bf16.msra.mxu0 %v1085_v61 }
 0x126   :  { %v146_v51 = vpop.f32.mrb[0].mxu0 }
 0x127   :  { %v147_v52 = vadd.f32 %v862_v50, %v146_v51  ;;  %v980_v53 = vpop.f32.mrb[1].mxu0  ;;  %v1109_v50 = vld [vmem:[#allocation8 + $0x28] sm:$0xff]   ;;  %v1110_v51 = vld [vmem:[#allocation8 + $0x30] sm:$0xff]  }
 0x128   :  { %v149_v54 = vpop.f32.mrb[2].mxu0 }
 0x129   :  { %v152_v55 = vmax.f32 %v147_v52, 0.0  ;;  %v981_v56 = vpop.f32.mrb[3].mxu0  ;;  %v1111_v52 = vld [vmem:[#allocation8 + $0x38] sm:$0xff]   ;;  %v914_v54 = vld [vmem:[%s1393_s6 + $0x5] ss:$0 sm:$0xff] }
 0x12b   :  { %v153_v57 = vpack.c.bf16 %v152_v55, %v152_v55 }
 0x12d   :  { %295 = vmatmul.mubr.bf16.vlgmr.msra.gmra.mrb[0].mxu1 %v153_v57 }
 0x12e   :  { %944 = vmatpush3.bf16.msra.mxu1 %v1089_v63 }
 0x12f   :  { %945 = vmatprep.subr.bf16.mxu1 %v1090_v1 }
 0x132   :  { %946 = vmatpush3.bf16.msra.mxu1 %v1091_v2 }
 0x133   :  { %947 = vmatprep.subr.bf16.mxu1 %v1092_v3 }
 0x136   :  { %948 = vmatpush3.bf16.msra.mxu1 %v1093_v4 }
 0x137   :  { %949 = vmatprep.subr.bf16.mxu1 %v1094_v5 }
 0x13a   :  { %950 = vmatpush3.bf16.msra.mxu1 %v1095_v6 }
 0x13b   :  { %951 = vmatprep.subr.bf16.mxu1 %v1096_v7 }
 0x13e   :  { %952 = vmatpush3.bf16.msra.mxu1 %v1097_v8 }
 0x13f   :  { %953 = vmatprep.subr.bf16.mxu1 %v1098_v9 }
 0x142   :  { %954 = vmatpush3.bf16.msra.mxu1 %v1099_v10 }
 0x143   :  { %955 = vmatprep.subr.bf16.mxu1 %v1100_v28 }
 0x146   :  { %956 = vmatpush3.bf16.msra.mxu1 %v1101_v29 }
 0x147   :  { %957 = vmatprep.subr.bf16.mxu1 %v1102_v30 }
 0x14a   :  { %958 = vmatpush3.bf16.msra.mxu1 %v1103_v31 }
 0x14b   :  { %982 = vmatprep.subr.bf16.mxu1 %v1238_v0 }
 0x200   :  { %v296_v18 = vpop.f32.mrb[0].mxu1 }
 0x201   :  { %v297_v19 = vadd.f32 %v296_v18, %v175_v16  ;;  %v298_v20 = vpop.f32.mrb[1].mxu1 }
 0x202   :  { %v299_v21 = vadd.f32 %v298_v20, %v179_v17  ;;  %v300_v22 = vpop.f32.mrb[2].mxu1 }
 0x203   :  { %v303_v23 = vmax.f32 %v297_v19, 0.0  ;;  %v301_v24 = vpop.f32.mrb[3].mxu1 }
 0x204   :  { %v304_v25 = vmax.f32 %v299_v21, 0.0 }
 0x205   :  { %v305_v27 = vpack.c.bf16 %v303_v23, %v303_v23 }
 0x206   :  { %v306_v26 = vpack.c.bf16 %v304_v25, %v304_v25 }
 0x208   :  { %543 = vmatprep.mubr.bf16.mxu0 %v306_v26 }
 0x209   :  { %544 = vmatmul.mubr.bf16.vlgmr.msra.gmra.mrb[4].mxu0 %v305_v27 }
 0x2dc   :  { %v545_v35 = vpop.f32.mrb[4].mxu0 }
 0x2dd   :  { %v546_v36 = vadd.f32 %v545_v35, %v344_v33  ;;  %v547_v37 = vpop.f32.mrb[5].mxu0 }
 0x2de   :  { %v548_v38 = vadd.f32 %v547_v37, %v348_v34  ;;  %v549_v39 = vpop.f32.mrb[6].mxu0 }
 0x2df   :  { %v552_v40 = vmax.f32 %v546_v36, 0.0  ;;  %v550_v41 = vpop.f32.mrb[7].mxu0 }
 0x2e0   :  { %v553_v42 = vmax.f32 %v548_v38, 0.0 }
 0x2e1   :  { %v554_v45 = vpack.c.bf16 %v552_v40, %v552_v40 }
 0x2e2   :  { %v555_v43 = vpack.c.bf16 %v553_v42, %v553_v42 }
 0x2e4   :  { %723 = vmatprep.mubr.bf16.mxu1 %v555_v43 }
 0x2e5   :  { %724 = vmatmul.mubr.bf16.vlgmr.msra.gmra.mrb[4].mxu1 %v554_v45 }
 0x2e6   :  { %983 = vmatpush3.bf16.msra.mxu1 %v1104_v44  ;;  %998 = vmatprep.mubr.msk.bf16.mxu1 %vm1239_vm0, %v1238_v0 }
 0x2e7   :  { %984 = vmatprep.subr.bf16.mxu1 %v1238_v0 }
 0x2ea   :  { %985 = vmatpush3.bf16.msra.mxu1 %v1105_v46 }
 0x2eb   :  { %986 = vmatprep.subr.bf16.mxu1 %v1238_v0 }
 0x2ee   :  { %987 = vmatpush3.bf16.msra.mxu1 %v1106_v47 }
 0x2ef   :  { %988 = vmatprep.subr.bf16.mxu1 %v1238_v0 }
 0x2f2   :  { %989 = vmatpush3.bf16.msra.mxu1 %v1107_v48 }
 0x2f3   :  { %990 = vmatprep.subr.bf16.mxu1 %v1238_v0 }
 0x2f6   :  { %991 = vmatpush3.bf16.msra.mxu1 %v1108_v49 }
 0x2f7   :  { %992 = vmatprep.subr.bf16.mxu1 %v1238_v0 }
 0x2fa   :  { %993 = vmatpush3.bf16.msra.mxu1 %v1109_v50 }
 0x2fb   :  { %994 = vmatprep.subr.bf16.mxu1 %v1238_v0 }
 0x2fe   :  { %995 = vmatpush3.bf16.msra.mxu1 %v1110_v51 }
 0x2ff   :  { %996 = vmatprep.subr.bf16.mxu1 %v1238_v0 }
 0x302   :  { %997 = vmatpush3.bf16.msra.mxu1 %v1111_v52 }
 0x3b8   :  { %v959_v53 = vpop.f32.mrb[4].mxu1 }
 0x3b9   :  { %v960_v55 = vpop.f32.mrb[5].mxu1 }
 0x3ba   :  { %v961_v56 = vadd.f32 %v960_v55, %v959_v53  ;;  %v962_v57 = vpop.f32.mrb[6].mxu1 }
 0x3bb   :  { %v963_v58 = vpop.f32.mrb[7].mxu1 }
 0x3bc   :  { %v726_v59 = vadd.f32 %v961_v56, %v914_v54 }
 0x3be   :  { %v731_v60 = vmax.f32 %v726_v59, 0.0 }
 0x3c0   :  { %v732_v61 = vpack.c.bf16 %v731_v60, %v731_v60 }
 0x3c2   :  { %999 = vmatmul.mubr.bf16.vlgmr.msra.gmra.mrb[8].mxu1 %v732_v61 }
 0x495   :  { %v838_v0 = vpop.f32.mrb[8].mxu1 }
 0x496   :  { %v839_v63 = vadd.f32 %v931_v62, %v838_v0  ;;  %v1000_v1 = vpop.f32.mrb[9].mxu1 }
 0x497   :  { %v841_v2 = vpop.f32.mrb[10].mxu1 }
 0x498   :  { %844 = vst [vmem:[#allocation10] sm:$0xff] %v839_v63  ;;  %v1001_v3 = vpop.f32.mrb[11].mxu1 }
 0x499   :  { %1211 = shalt.err (!%p1208_p8)
}
 0x49a   :  { %s1212_s6 = scalar_lea.hbm %s1394_s7, 128 }
 0x49b   :  { %p1213_p9 = scmp.ne.s32.totalorder %s1394_s7, %s1212_s6  ;;  %p1216_p10 = scmp.lt.u32.totalorder %s1212_s6, %s1394_s7 }
 0x49d   :  { %p1218_p11 = pnand %p1216_p10, %p1213_p9 }
 0x49f   :  { %1221 = shalt.err (!%p1218_p11)
}
 0x4a0   :  { %854 = dma.vmem_to_hbm [thread:$0]  %s852_s16, 128, %s1394_s7, [#allocation4]  }
 0x4a1   :  { %1228 = dma.done.wait [#allocation4], 128  }
 0x4a2   :  { %1229 = vsyncadd [#allocation4], 4294967168 }
 0x4a3   :  { %858 = vsyncpa [#allocation3], 1 }
 0x4a4   :  { %859 = vsyncpa [#allocation6], 1 }
 0x4a5   :  { %860 = vsyncpa [#allocation9], 1 }
 0x4a6   :  { %861 = vsyncpa [#allocation4], 1 }

</bundles_post_ra>
